<compile_context>
chip_gen: v7x
topology: tpu7x:2x2x1
jax: 0.10.0
libtpu: 0.0.40
codegen_flags: <defaults>
</compile_context>

<pallas_src>
import functools

import jax
import jax.numpy as jnp
import numpy as np
from jax.experimental import pallas as pl
from jax.experimental.pallas import tpu as pltpu


def _mkmeans_kernel(x_ref, c_ref, q_ref, lab_ref, *, M, K, D, bf16_dist):
    """One grid step == one batch tile, all M subspaces.

    x_ref:   (TB, M*D)  inputs, lane-dense flat layout
    c_ref:   (M, K, D)  full codebook (VMEM-resident; block index never changes)
    q_ref:   (TB, M*D)  quantized output (single dense store)
    lab_ref: (TB, M)    nearest-codeword index per subspace (int32)
    """
    # 0.5*||c_k||^2 per subspace, computed once per tile (tiny: M*K values).
    c_all = c_ref[...].astype(jnp.float32)                     # (M, K, D)
    half_csq = 0.5 * jnp.sum(c_all * c_all, axis=-1)           # (M, K)

    q_parts = []
    lab_parts = []
    # Static unroll over subspaces: M is small for PQ configs.
    # TODO(synk): for very large M, move M onto a second ("arbitrary") grid axis instead.
    for m in range(M):
        xm = x_ref[:, m * D:(m + 1) * D].astype(jnp.float32)   # (TB, D) sub-load
        cm = c_ref[m].astype(jnp.float32)                      # (K, D)

        # Nearest codeword: argmin ||x - c_k||^2 == argmax <x,c_k> - 0.5*||c_k||^2.
        # (||x||^2 is a per-row constant; -sqrt, /T and softmax are monotone -> dropped.
        #  The straight-through value y_hard - y_soft.detach() + y_soft equals the hard
        #  one-hot assignment in the forward pass.)
        if bf16_dist:
            dot = jnp.einsum("bd,kd->bk", xm.astype(jnp.bfloat16),
                             cm.astype(jnp.bfloat16),
                             preferred_element_type=jnp.float32)   # MXU, bf16-native
        else:
            dot = jnp.einsum("bd,kd->bk", xm, cm,
                             preferred_element_type=jnp.float32)   # MXU, f32
        score = dot - half_csq[m:m + 1, :]                         # (TB, K)

        iota = jax.lax.broadcasted_iota(jnp.int32, score.shape, 1)
        mx = jnp.max(score, axis=-1, keepdims=True)
        # first index attaining the max (matches torch.max keepdim tie-break)
        idx = jnp.min(jnp.where(score == mx, iota, K), axis=-1, keepdims=True)  # (TB, 1)

        onehot = (iota == idx).astype(jnp.float32)                 # (TB, K)
        q_parts.append(jnp.dot(onehot, cm,
                               preferred_element_type=jnp.float32))  # (TB, D), 2nd MXU matmul
        lab_parts.append(idx)

    # Lane-concatenate once and store dense: keeps the output stores full-width even when
    # D < 128 (per-subspace masked stores would otherwise bind the store slot).
    q_ref[...] = jnp.concatenate(q_parts, axis=1).astype(q_ref.dtype)
    lab_ref[...] = jnp.concatenate(lab_parts, axis=1).astype(jnp.int32)


def _plan(B, M, K, D):
    """Pick (vmem_limit_bytes, batch tile TB, padded batch size) per TPU generation."""
    MD = M * D
    try:
        # 128 MiB VMEM parts (v5e/v6e) -> ~64 MiB scoped; 64 MiB parts (v7x) -> 32 MiB.
        cap = int(pltpu.get_tpu_info().vmem_capacity_bytes)
    except Exception:  # conservative default, safe on every generation
        cap = 64 << 20
    vmem_limit = max(min(cap // 2, 64 << 20), 16 << 20)

    if B <= 128:
        return vmem_limit, B, B  # tiny batch: single step, no padding

    kpad = -(-K // 128) * 128
    dpad = -(-D // 128) * 128
    mpad = -(-M // 128) * 128
    # VMEM bytes per batch row: x/q double-buffered dense blocks, the q/label concat
    # temporaries, and the (TB, K)-shaped distance / one-hot temporaries of one subspace.
    per_row = 4 * (6 * MD + 2 * mpad + 4 * kpad + 2 * dpad)
    # resident codebook (double-buffered, lane-padded VMEM tile) + compiler slack
    fixed = 2 * 4 * M * (-(-K // 8) * 8) * dpad + (2 << 20)
    # TODO(synk): if the codebook alone exceeds the scoped VMEM limit, tile K on a second
    # ("arbitrary") grid axis instead of keeping it fully resident.
    budget_rows = max(128, (vmem_limit - fixed) // per_row)

    b_ceil128 = -(-B // 128) * 128
    tb = 128
    for cand in (4096, 2048, 1024, 512, 256, 128):
        # keep >= 2 grid steps so the "parallel" axis actually shards on v7x megacore
        if cand <= budget_rows and 2 * cand <= b_ceil128:
            tb = cand
            break
    b_pad = -(-B // tb) * tb
    return vmem_limit, tb, b_pad


def mkmeans_forward(x, center, T, *, bf16_dist=None):
    """x: (B, M, D), center: (M, K, D) -> (quantized (B,M,D), center, label (B,M,1) int32).

    T only scales the softmax, which does not change the forward (straight-through
    hard-assignment) value, so it never enters the kernel.
    """
    del T
    B, M, D = x.shape
    Mc, K, Dc = center.shape
    assert (M, D) == (Mc, Dc)
    MD = M * D

    if bf16_dist is None:
        # bf16 distances only pay off once K is large enough for the f32 MXU passes to
        # bind (v5e/v6e); bf16 can flip labels on near-tie codewords, so keep it off
        # at small K where the f32 path is already HBM-bound.
        bf16_dist = K >= 128

    vmem_limit, TB, B_pad = _plan(B, M, K, D)

    # Native layout, no HBM transposes: (B, M, D) -> (B, M*D) is a free contiguous merge.
    x_flat = x.astype(jnp.float32).reshape(B, MD)
    if B_pad != B:
        # Pad to a whole number of tiles (keeps every block aligned and the VMEM budget
        # bounded); the padded rows are computed then sliced off.
        x_flat = jnp.pad(x_flat, ((0, B_pad - B), (0, 0)))
    c32 = center.astype(jnp.float32)

    grid = (B_pad // TB,)
    kernel = functools.partial(_mkmeans_kernel, M=M, K=K, D=D, bf16_dist=bf16_dist)

    cost = pl.CostEstimate(
        flops=4 * B_pad * M * K * D,  # distance matmul + one-hot gather matmul
        transcendentals=0,
        # codebook is DMA'd once (its block index never changes); labels are int32
        bytes_accessed=4 * (2 * B_pad * MD + M * K * D + B_pad * M),
    )

    q_flat, lab = pl.pallas_call(
        kernel,
        out_shape=(
            jax.ShapeDtypeStruct((B_pad, MD), x.dtype),
            jax.ShapeDtypeStruct((B_pad, M), jnp.int32),
        ),
        grid_spec=pltpu.PrefetchScalarGridSpec(
            num_scalar_prefetch=0,
            grid=grid,
            in_specs=[
                pl.BlockSpec((TB, MD), lambda b: (b, 0)),       # x tile (lane-dense)
                pl.BlockSpec((M, K, D), lambda b: (0, 0, 0)),   # codebook, resident
            ],
            out_specs=(
                pl.BlockSpec((TB, MD), lambda b: (b, 0)),       # quantized tile
                pl.BlockSpec((TB, M), lambda b: (b, 0)),        # labels
            ),
        ),
        compiler_params=pltpu.CompilerParams(
            dimension_semantics=("parallel",),
            vmem_limit_bytes=int(vmem_limit),
        ),
        cost_estimate=cost,
    )(x_flat, c32)

    q = q_flat[:B].reshape(B, M, D)
    label = lab[:B][:, :, None]   # (B, M, 1) int32 (torch returns int64)
    return q, center, label


def _reference_forward(x, center, T):
    """Plain-JAX mirror of the PyTorch forward (correctness check)."""
    x1 = jnp.transpose(x, (1, 2, 0))                          # (M, D, B)
    x_sqlen = jnp.sum(x1 * x1, axis=1)                        # (M, B)
    dot = jnp.einsum("mkd,mdb->mkb", center, x1)              # (M, K, B)
    c_sqlen = jnp.sum(center * center, axis=-1)               # (M, K)
    dist = c_sqlen[..., None] - 2.0 * dot + x_sqlen[:, None, :]
    dist = -jnp.sqrt(jnp.maximum(dist, 0.0))                  # clamp: fp cancellation can go < 0
    dist = jnp.transpose(dist, (2, 0, 1))                     # (B, M, K)
    y_soft = jax.nn.softmax(dist / T, axis=-1)
    idx = jnp.argmax(y_soft, axis=-1)                         # (B, M)
    y_hard = jax.nn.one_hot(idx, center.shape[1], dtype=jnp.float32)
    assign = y_hard - y_soft + y_soft                         # forward value
    q = jnp.einsum("bmk,mkd->bmd", assign, center)
    return q, idx[..., None].astype(jnp.int32)


if __name__ == "__main__":
    # Small shapes consistent with the module: (B, M, D) inputs, (M, K, D) codebooks.
    B, M, K, D = 8, 4, 16, 32
    T = 0.1

    key = jax.random.PRNGKey(0)
    kx, kc = jax.random.split(key)
    x = jax.random.normal(kx, (B, M, D), dtype=jnp.float32)
    # nn.init.normal_(self.center, std=0.01), deterministic
    center = (0.01 * jax.random.normal(kc, (M, K, D))).astype(jnp.float32)

    q, c_out, label = mkmeans_forward(x, center, T)
    q = jax.block_until_ready(q)
    label = jax.block_until_ready(label)

    q_ref, label_ref = _reference_forward(x, center, T)
    assert q.shape == (B, M, D) and label.shape == (B, M, 1) and c_out.shape == (M, K, D)
    assert np.allclose(np.asarray(q), np.asarray(q_ref), atol=1e-5), "quantized output mismatch"
    assert np.array_equal(np.asarray(label), np.asarray(label_ref)), "label mismatch"

    print("KERNEL_OK")
</pallas_src>

<mosaic_0001>
module attributes {stable_mosaic.version = 11 : i64} {
  func.func @_mkmeans_kernel(%arg0: i32, %arg1: memref<8x128xf32, #tpu.memory_space<vmem>>, %arg2: memref<4x16x32xf32, #tpu.memory_space<vmem>>, %arg3: memref<8x128xf32, #tpu.memory_space<vmem>>, %arg4: memref<8x4xi32, #tpu.memory_space<vmem>>) attributes {dimension_semantics = [#tpu.dimension_semantics<parallel>], iteration_bounds = array<i64: 1>, scalar_prefetch = 0 : i64, scratch_operands = 0 : i64, tpu.core_type = #tpu.core_type<tc>, window_params = [{transform_indices = @transform_0, window_bounds = array<i64: 8, 128>}, {pipeline_mode = #tpu.pipeline_mode<synchronous>, transform_indices = @transform_1, window_bounds = array<i64: 4, 16, 32>}, {transform_indices = @transform_2, window_bounds = array<i64: 8, 128>}, {transform_indices = @transform_3, window_bounds = array<i64: 8, 4>}]} {
    %c0 = arith.constant 0 : index
    %c0_0 = arith.constant 0 : index
    %c0_1 = arith.constant 0 : index
    %0 = vector.load %arg2[%c0, %c0_0, %c0_1] : memref<4x16x32xf32, #tpu.memory_space<vmem>>, vector<4x16x32xf32>
    %1 = arith.mulf %0, %0 : vector<4x16x32xf32>
    %cst = arith.constant dense<0.000000e+00> : vector<4x16xf32>
    %2 = vector.multi_reduction <add>, %1, %cst [2] : vector<4x16x32xf32> to vector<4x16xf32>
    %cst_2 = arith.constant 5.000000e-01 : f32
    %3 = vector.broadcast %cst_2 : f32 to vector<4x16xf32>
    %4 = arith.mulf %3, %2 : vector<4x16xf32>
    %c0_3 = arith.constant 0 : index
    %c0_4 = arith.constant 0 : index
    %5 = vector.load %arg1[%c0_3, %c0_4] : memref<8x128xf32, #tpu.memory_space<vmem>>, vector<8x32xf32>
    %c0_5 = arith.constant 0 : index
    %c0_6 = arith.constant 0 : index
    %c0_7 = arith.constant 0 : index
    %6 = vector.load %arg2[%c0_5, %c0_6, %c0_7] : memref<4x16x32xf32, #tpu.memory_space<vmem>>, vector<1x16x32xf32>
    %7 = vector.shape_cast %6 : vector<1x16x32xf32> to vector<16x32xf32>
    "tpu.trace_start"() <{level = 10 : i32, message = "bd,kd->bk"}> : () -> ()
    %cst_8 = arith.constant dense<0.000000e+00> : vector<8x16xf32>
    %8 = tpu.matmul %5, %7, %cst_8 {dimension_numbers = #tpu.dot_dimension_numbers<[1], [1], [0], [0], [0, 0, 1, 0], [], []>} : vector<8x32xf32>, vector<16x32xf32>, vector<8x16xf32> -> vector<8x16xf32>
    "tpu.trace_stop"() : () -> ()
    %9 = vector.extract_strided_slice %4 {offsets = [0, 0], sizes = [1, 16], strides = [1, 1]} : vector<4x16xf32> to vector<1x16xf32>
    %10 = vector.broadcast %9 : vector<1x16xf32> to vector<8x16xf32>
    %11 = arith.subf %8, %10 : vector<8x16xf32>
    %12 = tpu.iota {dimensions = array<i32: 1>} : vector<8x16xi32>
    %cst_9 = arith.constant dense<0xFF800000> : vector<8xf32>
    %13 = vector.multi_reduction <maximumf>, %11, %cst_9 [1] : vector<8x16xf32> to vector<8xf32>
    %14 = vector.shape_cast %13 : vector<8xf32> to vector<8x1xf32>
    %15 = vector.broadcast %14 : vector<8x1xf32> to vector<8x16xf32>
    %16 = arith.cmpf oeq, %11, %15 : vector<8x16xf32>
    %c16_i32 = arith.constant 16 : i32
    %17 = vector.broadcast %c16_i32 : i32 to vector<8x16xi32>
    %18 = arith.select %16, %12, %17 : vector<8x16xi1>, vector<8x16xi32>
    %cst_10 = arith.constant dense<2147483647> : vector<8xi32>
    %19 = vector.multi_reduction <minsi>, %18, %cst_10 [1] : vector<8x16xi32> to vector<8xi32>
    %20 = vector.shape_cast %19 : vector<8xi32> to vector<8x1xi32>
    %21 = vector.broadcast %20 : vector<8x1xi32> to vector<8x16xi32>
    %22 = arith.cmpi eq, %12, %21 : vector<8x16xi32>
    %23 = arith.extui %22 : vector<8x16xi1> to vector<8x16xi32>
    %24 = arith.sitofp %23 : vector<8x16xi32> to vector<8x16xf32>
    %cst_11 = arith.constant dense<0.000000e+00> : vector<8x32xf32>
    %25 = tpu.matmul %24, %7, %cst_11 {dimension_numbers = #tpu.dot_dimension_numbers<[1], [0], [0], [1], [0, 0, 1, 1], [], []>} : vector<8x16xf32>, vector<16x32xf32>, vector<8x32xf32> -> vector<8x32xf32>
    %c0_12 = arith.constant 0 : index
    %c32 = arith.constant 32 : index
    %26 = vector.load %arg1[%c0_12, %c32] : memref<8x128xf32, #tpu.memory_space<vmem>>, vector<8x32xf32>
    %c1 = arith.constant 1 : index
    %c0_13 = arith.constant 0 : index
    %c0_14 = arith.constant 0 : index
    %27 = vector.load %arg2[%c1, %c0_13, %c0_14] : memref<4x16x32xf32, #tpu.memory_space<vmem>>, vector<1x16x32xf32>
    %28 = vector.shape_cast %27 : vector<1x16x32xf32> to vector<16x32xf32>
    "tpu.trace_start"() <{level = 10 : i32, message = "bd,kd->bk"}> : () -> ()
    %cst_15 = arith.constant dense<0.000000e+00> : vector<8x16xf32>
    %29 = tpu.matmul %26, %28, %cst_15 {dimension_numbers = #tpu.dot_dimension_numbers<[1], [1], [0], [0], [0, 0, 1, 0], [], []>} : vector<8x32xf32>, vector<16x32xf32>, vector<8x16xf32> -> vector<8x16xf32>
    "tpu.trace_stop"() : () -> ()
    %30 = vector.extract_strided_slice %4 {offsets = [1, 0], sizes = [1, 16], strides = [1, 1]} : vector<4x16xf32> to vector<1x16xf32>
    %31 = vector.broadcast %30 : vector<1x16xf32> to vector<8x16xf32>
    %32 = arith.subf %29, %31 : vector<8x16xf32>
    %33 = tpu.iota {dimensions = array<i32: 1>} : vector<8x16xi32>
    %cst_16 = arith.constant dense<0xFF800000> : vector<8xf32>
    %34 = vector.multi_reduction <maximumf>, %32, %cst_16 [1] : vector<8x16xf32> to vector<8xf32>
    %35 = vector.shape_cast %34 : vector<8xf32> to vector<8x1xf32>
    %36 = vector.broadcast %35 : vector<8x1xf32> to vector<8x16xf32>
    %37 = arith.cmpf oeq, %32, %36 : vector<8x16xf32>
    %c16_i32_17 = arith.constant 16 : i32
    %38 = vector.broadcast %c16_i32_17 : i32 to vector<8x16xi32>
    %39 = arith.select %37, %33, %38 : vector<8x16xi1>, vector<8x16xi32>
    %cst_18 = arith.constant dense<2147483647> : vector<8xi32>
    %40 = vector.multi_reduction <minsi>, %39, %cst_18 [1] : vector<8x16xi32> to vector<8xi32>
    %41 = vector.shape_cast %40 : vector<8xi32> to vector<8x1xi32>
    %42 = vector.broadcast %41 : vector<8x1xi32> to vector<8x16xi32>
    %43 = arith.cmpi eq, %33, %42 : vector<8x16xi32>
    %44 = arith.extui %43 : vector<8x16xi1> to vector<8x16xi32>
    %45 = arith.sitofp %44 : vector<8x16xi32> to vector<8x16xf32>
    %cst_19 = arith.constant dense<0.000000e+00> : vector<8x32xf32>
    %46 = tpu.matmul %45, %28, %cst_19 {dimension_numbers = #tpu.dot_dimension_numbers<[1], [0], [0], [1], [0, 0, 1, 1], [], []>} : vector<8x16xf32>, vector<16x32xf32>, vector<8x32xf32> -> vector<8x32xf32>
    %c0_20 = arith.constant 0 : index
    %c64 = arith.constant 64 : index
    %47 = vector.load %arg1[%c0_20, %c64] : memref<8x128xf32, #tpu.memory_space<vmem>>, vector<8x32xf32>
    %c2 = arith.constant 2 : index
    %c0_21 = arith.constant 0 : index
    %c0_22 = arith.constant 0 : index
    %48 = vector.load %arg2[%c2, %c0_21, %c0_22] : memref<4x16x32xf32, #tpu.memory_space<vmem>>, vector<1x16x32xf32>
    %49 = vector.shape_cast %48 : vector<1x16x32xf32> to vector<16x32xf32>
    "tpu.trace_start"() <{level = 10 : i32, message = "bd,kd->bk"}> : () -> ()
    %cst_23 = arith.constant dense<0.000000e+00> : vector<8x16xf32>
    %50 = tpu.matmul %47, %49, %cst_23 {dimension_numbers = #tpu.dot_dimension_numbers<[1], [1], [0], [0], [0, 0, 1, 0], [], []>} : vector<8x32xf32>, vector<16x32xf32>, vector<8x16xf32> -> vector<8x16xf32>
    "tpu.trace_stop"() : () -> ()
    %51 = vector.extract_strided_slice %4 {offsets = [2, 0], sizes = [1, 16], strides = [1, 1]} : vector<4x16xf32> to vector<1x16xf32>
    %52 = vector.broadcast %51 : vector<1x16xf32> to vector<8x16xf32>
    %53 = arith.subf %50, %52 : vector<8x16xf32>
    %54 = tpu.iota {dimensions = array<i32: 1>} : vector<8x16xi32>
    %cst_24 = arith.constant dense<0xFF800000> : vector<8xf32>
    %55 = vector.multi_reduction <maximumf>, %53, %cst_24 [1] : vector<8x16xf32> to vector<8xf32>
    %56 = vector.shape_cast %55 : vector<8xf32> to vector<8x1xf32>
    %57 = vector.broadcast %56 : vector<8x1xf32> to vector<8x16xf32>
    %58 = arith.cmpf oeq, %53, %57 : vector<8x16xf32>
    %c16_i32_25 = arith.constant 16 : i32
    %59 = vector.broadcast %c16_i32_25 : i32 to vector<8x16xi32>
    %60 = arith.select %58, %54, %59 : vector<8x16xi1>, vector<8x16xi32>
    %cst_26 = arith.constant dense<2147483647> : vector<8xi32>
    %61 = vector.multi_reduction <minsi>, %60, %cst_26 [1] : vector<8x16xi32> to vector<8xi32>
    %62 = vector.shape_cast %61 : vector<8xi32> to vector<8x1xi32>
    %63 = vector.broadcast %62 : vector<8x1xi32> to vector<8x16xi32>
    %64 = arith.cmpi eq, %54, %63 : vector<8x16xi32>
    %65 = arith.extui %64 : vector<8x16xi1> to vector<8x16xi32>
    %66 = arith.sitofp %65 : vector<8x16xi32> to vector<8x16xf32>
    %cst_27 = arith.constant dense<0.000000e+00> : vector<8x32xf32>
    %67 = tpu.matmul %66, %49, %cst_27 {dimension_numbers = #tpu.dot_dimension_numbers<[1], [0], [0], [1], [0, 0, 1, 1], [], []>} : vector<8x16xf32>, vector<16x32xf32>, vector<8x32xf32> -> vector<8x32xf32>
    %c0_28 = arith.constant 0 : index
    %c96 = arith.constant 96 : index
    %68 = vector.load %arg1[%c0_28, %c96] : memref<8x128xf32, #tpu.memory_space<vmem>>, vector<8x32xf32>
    %c3 = arith.constant 3 : index
    %c0_29 = arith.constant 0 : index
    %c0_30 = arith.constant 0 : index
    %69 = vector.load %arg2[%c3, %c0_29, %c0_30] : memref<4x16x32xf32, #tpu.memory_space<vmem>>, vector<1x16x32xf32>
    %70 = vector.shape_cast %69 : vector<1x16x32xf32> to vector<16x32xf32>
    "tpu.trace_start"() <{level = 10 : i32, message = "bd,kd->bk"}> : () -> ()
    %cst_31 = arith.constant dense<0.000000e+00> : vector<8x16xf32>
    %71 = tpu.matmul %68, %70, %cst_31 {dimension_numbers = #tpu.dot_dimension_numbers<[1], [1], [0], [0], [0, 0, 1, 0], [], []>} : vector<8x32xf32>, vector<16x32xf32>, vector<8x16xf32> -> vector<8x16xf32>
    "tpu.trace_stop"() : () -> ()
    %72 = vector.extract_strided_slice %4 {offsets = [3, 0], sizes = [1, 16], strides = [1, 1]} : vector<4x16xf32> to vector<1x16xf32>
    %73 = vector.broadcast %72 : vector<1x16xf32> to vector<8x16xf32>
    %74 = arith.subf %71, %73 : vector<8x16xf32>
    %75 = tpu.iota {dimensions = array<i32: 1>} : vector<8x16xi32>
    %cst_32 = arith.constant dense<0xFF800000> : vector<8xf32>
    %76 = vector.multi_reduction <maximumf>, %74, %cst_32 [1] : vector<8x16xf32> to vector<8xf32>
    %77 = vector.shape_cast %76 : vector<8xf32> to vector<8x1xf32>
    %78 = vector.broadcast %77 : vector<8x1xf32> to vector<8x16xf32>
    %79 = arith.cmpf oeq, %74, %78 : vector<8x16xf32>
    %c16_i32_33 = arith.constant 16 : i32
    %80 = vector.broadcast %c16_i32_33 : i32 to vector<8x16xi32>
    %81 = arith.select %79, %75, %80 : vector<8x16xi1>, vector<8x16xi32>
    %cst_34 = arith.constant dense<2147483647> : vector<8xi32>
    %82 = vector.multi_reduction <minsi>, %81, %cst_34 [1] : vector<8x16xi32> to vector<8xi32>
    %83 = vector.shape_cast %82 : vector<8xi32> to vector<8x1xi32>
    %84 = vector.broadcast %83 : vector<8x1xi32> to vector<8x16xi32>
    %85 = arith.cmpi eq, %75, %84 : vector<8x16xi32>
    %86 = arith.extui %85 : vector<8x16xi1> to vector<8x16xi32>
    %87 = arith.sitofp %86 : vector<8x16xi32> to vector<8x16xf32>
    %cst_35 = arith.constant dense<0.000000e+00> : vector<8x32xf32>
    %88 = tpu.matmul %87, %70, %cst_35 {dimension_numbers = #tpu.dot_dimension_numbers<[1], [0], [0], [1], [0, 0, 1, 1], [], []>} : vector<8x16xf32>, vector<16x32xf32>, vector<8x32xf32> -> vector<8x32xf32>
    %89 = tpu.concatenate %25, %46, %67, %88 in 1 : vector<8x32xf32>, vector<8x32xf32>, vector<8x32xf32>, vector<8x32xf32> -> vector<8x128xf32>
    %c0_36 = arith.constant 0 : index
    %c0_37 = arith.constant 0 : index
    %90 = vector.load %arg3[%c0_36, %c0_37] : memref<8x128xf32, #tpu.memory_space<vmem>>, vector<8x128xf32>
    tpu.vector_store %arg3[%c0_36, %c0_37], %89 {strides = array<i32>} : memref<8x128xf32, #tpu.memory_space<vmem>>, vector<8x128xf32>,
    %91 = tpu.concatenate %20, %41, %62, %83 in 1 : vector<8x1xi32>, vector<8x1xi32>, vector<8x1xi32>, vector<8x1xi32> -> vector<8x4xi32>
    %c0_38 = arith.constant 0 : index
    %c0_39 = arith.constant 0 : index
    %92 = vector.load %arg4[%c0_38, %c0_39] : memref<8x4xi32, #tpu.memory_space<vmem>>, vector<8x4xi32>
    tpu.vector_store %arg4[%c0_38, %c0_39], %91 {strides = array<i32>} : memref<8x4xi32, #tpu.memory_space<vmem>>, vector<8x4xi32>,
    return
  }
  func.func @transform_0(%arg0: i32) -> (i32, i32) {
    %c0_i32 = arith.constant 0 : i32
    %c0_i32_0 = arith.constant 0 : i32
    return %arg0, %c0_i32 : i32, i32
  }
  func.func @transform_1(%arg0: i32) -> (i32, i32, i32) {
    %c0_i32 = arith.constant 0 : i32
    %c0_i32_0 = arith.constant 0 : i32
    %c0_i32_1 = arith.constant 0 : i32
    %c0_i32_2 = arith.constant 0 : i32
    return %c0_i32, %c0_i32_0, %c0_i32_1 : i32, i32, i32
  }
  func.func @transform_2(%arg0: i32) -> (i32, i32) {
    %c0_i32 = arith.constant 0 : i32
    %c0_i32_0 = arith.constant 0 : i32
    return %arg0, %c0_i32 : i32, i32
  }
  func.func @transform_3(%arg0: i32) -> (i32, i32) {
    %c0_i32 = arith.constant 0 : i32
    %c0_i32_0 = arith.constant 0 : i32
    return %arg0, %c0_i32 : i32, i32
  }
}

</mosaic_0001>

<bundles_post_ra>
// kernel: tpu_custom_call.1
= control target key start
LH: loop header
LB: loop body
LE: loop exit
PB: predicated region body
PF: predicated region fallthrough
CT: control target
= control target key end

     0   :  { %9 = vsyncpa [#allocation3], 0  ;;  %s1346_s0 = inlined_call_operand.hbm [shape: f32[8,128], index: 0, kind: input, shape index: {}]   ;;  %s1347_s1 = inlined_call_operand.hbm [shape: f32[4,16,32], index: 1, kind: input, shape index: {}]   ;;  %s1348_s2 = inlined_call_operand.hbm [shape: f32[8,128], index: 2, kind: output, shape index: {0}]   ;;  %s1349_s3 = inlined_call_operand.vmem [shape: s32[8,4], index: 3, kind: output, shape index: {1}]  }
   0x1   :  { %10 = vsyncpa [#allocation6], 0 }
   0x2   :  { %11 = vsyncpa [#allocation4], 0  ;;  %s1152_s12 = smov [#allocation2]   ;;  %s1153_s14 = smov [#allocation5]  }
   0x3   :  { %s18_s13 = sshll.u32 %s1152_s12, 4  ;;  %s27_s15 = sshll.u32 %s1153_s14, 4  ;;  %s19_s13 = int_to_ptr.vmem [resolvable:$true] %s18_s13  ;;  %s1183_s15 = int_to_ptr.vmem [resolvable:$true] %s27_s15 }
   0x4   :  { %s1080_s18 = scalar_lea.hbm %s1346_s0, 128 }
   0x5   :  { %p1081_p0 = scmp.ne.s32.totalorder %s1346_s0, %s1080_s18  ;;  %p1084_p1 = scmp.lt.u32.totalorder %s1080_s18, %s1346_s0 }
   0x7   :  { %p1086_p2 = pnand %p1084_p1, %p1081_p0 }
   0x9   :  { %1089 = shalt.err (!%p1086_p2)
}
   0xa   :  { %s1090_s23 = scalar_lea.vmem %s19_s13, 128  ;;  %p1095_p4 = scmp.lt.s32.totalorder %s19_s13, %s19_s13 }
   0xb   :  { %p1091_p3 = scmp.ne.s32.totalorder %s19_s13, %s1090_s23  ;;  %p1096_p5 = scmp.lt.s32.totalorder %s1090_s23, %s1090_s23 }
   0xd   :  { %p1097_p6 = por %p1096_p5, %p1095_p4 }
   0xf   :  { %p1098_p7 = pnand %p1097_p6, %p1091_p3 }
  0x11   :  { %1101 = shalt.err (!%p1098_p7)
}
  0x12   :  { %21 = dma.hbm_to_vmem [thread:$0]  %s1346_s0, 128, %s19_s13, [#allocation3]  }
  0x13   :  { %s1102_s28 = scalar_lea.hbm %s1347_s1, 1024 }
  0x14   :  { %p1103_p8 = scmp.ne.s32.totalorder %s1347_s1, %s1102_s28  ;;  %p1106_p9 = scmp.lt.u32.totalorder %s1102_s28, %s1347_s1 }
  0x16   :  { %p1108_p10 = pnand %p1106_p9, %p1103_p8 }
  0x18   :  { %1111 = shalt.err (!%p1108_p10)
}
  0x19   :  { %s1112_s6 = scalar_lea.vmem %s1183_s15, 1024  ;;  %p1117_p12 = scmp.lt.s32.totalorder %s1183_s15, %s1183_s15 }
  0x1a   :  { %p1113_p11 = scmp.ne.s32.totalorder %s1183_s15, %s1112_s6  ;;  %p1118_p13 = scmp.lt.s32.totalorder %s1112_s6, %s1112_s6 }
  0x1c   :  { %p1119_p0 = por %p1118_p13, %p1117_p12 }
  0x1e   :  { %p1120_p1 = pnand %p1119_p0, %p1113_p11 }
  0x20   :  { %1123 = shalt.err (!%p1120_p1)
}
  0x21   :  { %s1154_s0 = smov 128   ;;  %s1155_s7 = smov 8  }
  0x22   :  { %33 = dma.hbm_to_vmem [thread:$0]  %s1347_s1, 1024, %s1183_s15, [#allocation6], %s1154_s0, %s1154_s0, %s1155_s7  }
  0x23   :  { %1146 = dma.done.wait [#allocation3], 128  }
  0x24   :  { %1147 = vsyncadd [#allocation3], 4294967168 }
  0x25   :  { %1148 = dma.done.wait [#allocation6], 1024  }
  0x26   :  { %1149 = vsyncadd [#allocation6], 4294966272  ;;  %v1156_v0 = vmov 0.0|0.0   ;;  %vm1157_vm0 = vmmov 0   ;;  %v1158_v1 = vmov 0.0   ;;  %vm56_vm1 = vcmask 261120  }
  0x27   :  { %1041 = vmatprep.subr.bf16.mxu0 %v1156_v0  ;;  %989 = vmatprep.mubr.msk.f32.mxu0 %vm1157_vm0, %v1158_v1  ;;  %v40_v2 = vld [vmem:[#allocation5] sm:$0xff]  ;;  %v41_v3 = vld [vmem:[#allocation5 + $0x8] sm:$0xff]  ;;  %vm1222_vm2 = vmpackc.low %vm56_vm1, %vm56_vm1  ;;  %v171_v11 = vlaneseq  ;;  %vm182_vm3 = vcmask 130112   ;;  %vm198_vm4 = vcmask 130048   ;;  %s1159_s1 = smov 96   ;;  %s1160_s10 = smov 64  }
  0x28   :  { %1045 = vmatprep.subr.bf16.mxu1 %v1156_v0  ;;  %996 = vmatprep.mubr.msk.f32.mxu1 %vm1157_vm0, %v1158_v1  ;;  %v1042_v5 = vpack.c.bf16 %v41_v3, %v40_v2  ;;  %v48_v6 = vmul.f32 %v40_v2, %v40_v2  ;;  %v49_v7 = vmul.f32 %v41_v3, %v41_v3  ;;  %v1232_v10 = vld [vmem:[#allocation2] sm:$0xff]  ;;  %v297_v37 = vld [vmem:[#allocation5 + $0x10] sm:$0xff]  ;;  %s1161_s11 = smov 32   ;;  %vm913_vm13 = vcmask 7168   ;;  %s1162_s14 = smov [#allocation7]  }
  0x29   :  { %v1238_v13 = vand.u32 127, %v171_v11  ;;  %v174_v14 = vshrl.u32 %v171_v11, 7  ;;  %v298_v38 = vld [vmem:[#allocation5 + $0x18] sm:$0xff]  ;;  %v50_v40 = vmul.f32 %v297_v37, %v297_v37  ;;  %vm915_vm14 = vcmask 15360   ;;  %s927_s15 = sshll.u32 %s1162_s14, 4  ;;  %s928_s15 = int_to_ptr.vmem [resolvable:$true] %s927_s15 }
  0x2a   :  { %1044 = vmatpush3.bf16.xpose.msk.msra.mxu0 %vm1222_vm2, %v1042_v5  ;;  %v57_v8 = vsel %vm56_vm1, %v48_v6, 0.0  ;;  %1047 = vmatpush3.bf16.msra.mxu1 %v1042_v5  ;;  %v60_v9 = vsel %vm56_vm1, %v49_v7, 0.0  ;;  %v1049_v39 = vpack.c.bf16 %v298_v38, %v297_v37  ;;  %v51_v41 = vmul.f32 %v298_v38, %v298_v38  ;;  %p1129_p3 = scmp.lt.s32.totalorder %s928_s15, %s928_s15 }
  0x2b   :  { %58 = vadd.xlane.f32.xlu0 %v57_v8  ;;  %1048 = vmatprep.subr.bf16.mxu1 %v1156_v0  ;;  %v177_v15 = vadd.s32 4294967288, %v1238_v13  ;;  %v1242_v17 = vsub.s32 %v1238_v13, %v174_v14  ;;  %v63_v42 = vsel %vm56_vm1, %v50_v40, 0.0 }
  0x2c   :  { %1052 = vmatprep.subr.bf16.mxu0 %v1156_v0  ;;  %v66_v43 = vsel %vm56_vm1, %v51_v41, 0.0 }
  0x2d   :  { %v1244_v19 = vsub.s32 %v177_v15, %v174_v14  ;;  %v497_v14 = vld [vmem:[#allocation5 + $0x20] sm:$0xff]  ;;  %v498_v15 = vld [vmem:[#allocation5 + $0x28] sm:$0xff] }
  0x2f   :  { %61 = vadd.xlane.f32.xlu0 %v60_v9 }
  0x31   :  { %990 = vmatmul.mubr.msk.f32.vlgmr.msra.gmra.mrb[0].mxu0 %vm56_vm1, %v1232_v10 }
  0x32   :  { %1010 = vmatprep.mubr.msk.f32.mxu0 %vm1157_vm0, %v1158_v1  ;;  %1054 = vmatpush3.bf16.msra.mxu0 %v1049_v39 }
  0x33   :  { %1055 = vmatprep.subr.bf16.mxu0 %v1156_v0 }
  0xb8   :  { %v59_v12 = vpop.xlane.xlu0 %58 }
  0xb9   :  { %v81_v18 = vmul.f32 0.5, %v59_v12 }
  0xbb   :  { %v176_v21 = vrot.slane %v81_v18, %v1242_v17  ;;  %v52_v18 = vmul.f32 %v497_v14, %v497_v14 }
  0xbc   :  { %v62_v16 = vpop.xlane.xlu0 %61 }
  0xbd   :  { %v82_v20 = vmul.f32 0.5, %v62_v16  ;;  %v1056_v16 = vpack.c.bf16 %v498_v15, %v497_v14 }
  0xbf   :  { %v181_v22 = vrot.slane %v82_v20, %v1244_v19  ;;  %v53_v20 = vmul.f32 %v498_v15, %v498_v15 }
  0xc1   :  { %v183_v24 = vsel %vm182_vm3, %v181_v22, %v176_v21  ;;  %v69_v21 = vsel %vm56_vm1, %v52_v18, 0.0  ;;  %v72_v22 = vsel %vm56_vm1, %v53_v20, 0.0 }
 0x104   :  { %v165_v23 = vpop.f32.mrb[0].mxu0 }
 0x105   :  { %v197_v25 = vsub.f32 %v165_v23, %v183_v24  ;;  %v991_v26 = vpop.f32.mrb[1].mxu0 }
 0x107   :  { %v199_v27 = vsel %vm198_vm4, %v197_v25, -inf }
 0x108   :  { %200 = vmax.xlane.f32.xlu1 %v199_v27 }
 0x195   :  { %v201_v28 = vpop.xlane.xlu1 %200 }
 0x196   :  { %vm202_vm5 = vcmp.eq.f32.partialorder %v197_v25, %v201_v28 }
 0x197   :  { %v203_v29 = vsel %vm202_vm5, %v1238_v13, 16  ;;  %vm919_vm5 = vcmask 31744  }
 0x198   :  { %v204_v30 = vsel %vm198_vm4, %v203_v29, 2147483647 }
 0x199   :  { %v206_v31 = vshra.s32 %v204_v30, 16  ;;  %v205_v33 = vand.u32 65535, %v204_v30 }
 0x19b   :  { %v208_v32 = vcvt.s32.f32 %v206_v31  ;;  %v207_v35 = vcvt.s32.f32 %v205_v33 }
 0x19d   :  { %209 = vmin.xlane.f32.xlu1 %v208_v32 }
 0x1ae   :  { %300 = vrot.lane.b32.xlu1 %v1232_v10, %s1159_s1 }
 0x22a   :  { %v210_v34 = vpop.xlane.xlu1 %209 }
 0x22b   :  { %vm211_vm6 = vcmp.eq.f32.partialorder %v208_v32, %v210_v34  ;;  %v216_v44 = vcvt.f32.s32 %v210_v34 }
 0x22c   :  { %v212_v36 = vsel %vm211_vm6, %v207_v35, inf }
 0x22d   :  { %213 = vmin.xlane.f32.xlu0 %v212_v36  ;;  %v217_v46 = vshll.u32 %v216_v44, 16 }
 0x22e   :  { %v301_v50 = vpop.permute.xlu1 %300 }
 0x231   :  { %64 = vadd.xlane.f32.xlu0 %v63_v42 }
 0x235   :  { %67 = vadd.xlane.f32.xlu0 %v66_v43 }
 0x2ba   :  { %v214_v45 = vpop.xlane.xlu0 %213 }
 0x2bb   :  { %v215_v47 = vcvt.f32.s32 %v214_v45 }
 0x2bd   :  { %v1257_v48 = vadd.s32 %v217_v46, %v215_v47 }
 0x2be   :  { %v65_v51 = vpop.xlane.xlu0 %64 }
 0x2bf   :  { %vm219_vm7 = vcmp.eq.s32.totalorder %v1238_v13, %v1257_v48  ;;  %v83_v53 = vmul.f32 0.5, %v65_v51 }
 0x2c0   :  { %v944_v49 = vsel %vm219_vm7, 1.0, %v1158_v1  ;;  %vm908_vm7 = vcmask 523264  }
 0x2c1   :  { %997 = vmatmul.mubr.msk.f32.vlgmr.msra.gmra.mrb[0].mxu1 %vm198_vm4, %v944_v49  ;;  %v385_v57 = vrot.slane %v83_v53, %v1242_v17  ;;  %v698_v53 = vld [vmem:[#allocation5 + $0x38] sm:$0xff] }
 0x2c2   :  { %1051 = vmatpush3.bf16.xpose.msk.msra.mxu1 %vm1222_vm2, %v1049_v39  ;;  %1003 = vmatprep.mubr.msk.f32.mxu1 %vm1157_vm0, %v1158_v1  ;;  %v68_v52 = vpop.xlane.xlu0 %67 }
 0x2c3   :  { %1059 = vmatprep.subr.bf16.mxu1 %v1156_v0  ;;  %v84_v54 = vmul.f32 0.5, %v68_v52  ;;  %v697_v52 = vld [vmem:[#allocation5 + $0x30] sm:$0xff] }
 0x2c5   :  { %v389_v58 = vrot.slane %v84_v54, %v1244_v19  ;;  %v1063_v54 = vpack.c.bf16 %v698_v53, %v697_v52 }
 0x2c7   :  { %v390_v60 = vsel %vm182_vm3, %v389_v58, %v385_v57  ;;  %v55_v57 = vmul.f32 %v698_v53, %v698_v53 }
 0x2c9   :  { %1004 = vmatmul.mubr.msk.f32.vlgmr.msra.gmra.mrb[2].mxu1 %vm56_vm1, %v301_v50 }
 0x2ca   :  { %1024 = vmatprep.mubr.msk.f32.mxu1 %vm1157_vm0, %v1158_v1  ;;  %1061 = vmatpush3.bf16.msra.mxu1 %v1056_v16 }
 0x2cb   :  { %1062 = vmatprep.subr.bf16.mxu1 %v1156_v0 }
 0x394   :  { %v1271_v55 = vpop.f32.mrb[0].mxu1 }
 0x395   :  { %v998_v56 = vpop.f32.mrb[1].mxu1 }
 0x396   :  { %v54_v56 = vmul.f32 %v697_v52, %v697_v52 }
 0x398   :  { %v75_v58 = vsel %vm56_vm1, %v54_v56, 0.0 }
 0x39c   :  { %v376_v59 = vpop.f32.mrb[2].mxu1 }
 0x39d   :  { %v398_v61 = vsub.f32 %v376_v59, %v390_v60  ;;  %v1005_v62 = vpop.f32.mrb[3].mxu1  ;;  %v78_v59 = vsel %vm56_vm1, %v55_v57, 0.0 }
 0x39f   :  { %v399_v63 = vsel %vm198_vm4, %v398_v61, -inf }
 0x3a0   :  { %400 = vmax.xlane.f32.xlu0 %v399_v63 }
 0x42d   :  { %v401_v2 = vpop.xlane.xlu0 %400 }
 0x42e   :  { %vm402_vm8 = vcmp.eq.f32.partialorder %v398_v61, %v401_v2 }
 0x42f   :  { %v403_v3 = vsel %vm402_vm8, %v1238_v13, 16  ;;  %vm910_vm8 = vcmask 785408  }
 0x430   :  { %v404_v5 = vsel %vm198_vm4, %v403_v3, 2147483647 }
 0x431   :  { %v406_v6 = vshra.s32 %v404_v5, 16  ;;  %v405_v8 = vand.u32 65535, %v404_v5 }
 0x433   :  { %v408_v7 = vcvt.s32.f32 %v406_v6  ;;  %v407_v11 = vcvt.s32.f32 %v405_v8 }
 0x435   :  { %409 = vmin.xlane.f32.xlu0 %v408_v7 }
 0x44b   :  { %500 = vrot.lane.b32.xlu0 %v1232_v10, %s1160_s10 }
 0x46a   :  { %70 = vadd.xlane.f32.xlu0 %v69_v21 }
 0x46e   :  { %76 = vadd.xlane.f32.xlu0 %v75_v58 }
 0x472   :  { %79 = vadd.xlane.f32.xlu0 %v78_v59 }
 0x4c2   :  { %v410_v9 = vpop.xlane.xlu0 %409 }
 0x4c3   :  { %vm411_vm9 = vcmp.eq.f32.partialorder %v408_v7, %v410_v9  ;;  %v416_v23 = vcvt.f32.s32 %v410_v9 }
 0x4c4   :  { %v412_v12 = vsel %vm411_vm9, %v407_v11, inf }
 0x4c5   :  { %413 = vmin.xlane.f32.xlu1 %v412_v12  ;;  %v417_v25 = vshll.u32 %v416_v23, 16 }
 0x4c6   :  { %v501_v29 = vpop.permute.xlu0 %500 }
 0x4c9   :  { %73 = vadd.xlane.f32.xlu1 %v72_v22 }
 0x4f7   :  { %v71_v30 = vpop.xlane.xlu0 %70 }
 0x4f8   :  { %v85_v32 = vmul.f32 0.5, %v71_v30 }
 0x4fa   :  { %v585_v36 = vrot.slane %v85_v32, %v1242_v17 }
 0x4fb   :  { %v77_v7 = vpop.xlane.xlu0 %76 }
 0x4fc   :  { %v87_v9 = vmul.f32 0.5, %v77_v7 }
 0x4fe   :  { %v785_v14 = vrot.slane %v87_v9, %v1242_v17 }
 0x4ff   :  { %v80_v8 = vpop.xlane.xlu0 %79 }
 0x552   :  { %v414_v24 = vpop.xlane.xlu1 %413 }
 0x553   :  { %v415_v26 = vcvt.f32.s32 %v414_v24 }
 0x555   :  { %v418_v27 = vadd.s32 %v417_v25, %v415_v26 }
 0x556   :  { %v74_v31 = vpop.xlane.xlu1 %73 }
 0x557   :  { %vm419_vm10 = vcmp.eq.s32.totalorder %v1238_v13, %v418_v27  ;;  %v86_v33 = vmul.f32 0.5, %v74_v31 }
 0x558   :  { %v949_v28 = vsel %vm419_vm10, 1.0, %v1158_v1 }
 0x559   :  { %1011 = vmatmul.mubr.msk.f32.vlgmr.msra.gmra.mrb[2].mxu0 %vm198_vm4, %v949_v28  ;;  %v589_v37 = vrot.slane %v86_v33, %v1244_v19 }
 0x55a   :  { %1058 = vmatpush3.bf16.xpose.msk.msra.mxu0 %vm1222_vm2, %v1056_v16  ;;  %1017 = vmatprep.mubr.msk.f32.mxu0 %vm1157_vm0, %v1158_v1 }
 0x55b   :  { %1066 = vmatprep.subr.bf16.mxu0 %v1156_v0  ;;  %v590_v38 = vsel %vm182_vm3, %v589_v37, %v585_v36 }
 0x561   :  { %1018 = vmatmul.mubr.msk.f32.vlgmr.msra.gmra.mrb[4].mxu0 %vm56_vm1, %v501_v29 }
 0x562   :  { %1038 = vmatprep.mubr.msk.f32.mxu0 %vm1157_vm0, %v1158_v1  ;;  %1068 = vmatpush3.bf16.msra.mxu0 %v1063_v54 }
 0x62c   :  { %v1295_v34 = vpop.f32.mrb[2].mxu0 }
 0x62d   :  { %v1012_v35 = vpop.f32.mrb[3].mxu0 }
 0x634   :  { %v576_v0 = vpop.f32.mrb[4].mxu0 }
 0x635   :  { %v598_v39 = vsub.f32 %v576_v0, %v590_v38  ;;  %v1019_v40 = vpop.f32.mrb[5].mxu0 }
 0x637   :  { %v599_v41 = vsel %vm198_vm4, %v598_v39, -inf }
 0x638   :  { %600 = vmax.xlane.f32.xlu1 %v599_v41 }
 0x6c5   :  { %v601_v42 = vpop.xlane.xlu1 %600 }
 0x6c6   :  { %vm602_vm11 = vcmp.eq.f32.partialorder %v598_v39, %v601_v42 }
 0x6c7   :  { %v603_v43 = vsel %vm602_vm11, %v1238_v13, 16 }
 0x6c8   :  { %v604_v44 = vsel %vm198_vm4, %v603_v43, 2147483647 }
 0x6c9   :  { %v606_v45 = vshra.s32 %v604_v44, 16  ;;  %v605_v47 = vand.u32 65535, %v604_v44 }
 0x6cb   :  { %v608_v46 = vcvt.s32.f32 %v606_v45  ;;  %v607_v50 = vcvt.s32.f32 %v605_v47 }
 0x6cd   :  { %609 = vmin.xlane.f32.xlu1 %v608_v46 }
 0x75a   :  { %v610_v49 = vpop.xlane.xlu1 %609 }
 0x75b   :  { %vm611_vm12 = vcmp.eq.f32.partialorder %v608_v46, %v610_v49  ;;  %v616_v60 = vcvt.f32.s32 %v610_v49 }
 0x75c   :  { %v612_v51 = vsel %vm611_vm12, %v607_v50, inf }
 0x75d   :  { %613 = vmin.xlane.f32.xlu1 %v612_v51  ;;  %v617_v62 = vshll.u32 %v616_v60, 16 }
 0x76e   :  { %700 = vrot.lane.b32.xlu1 %v1232_v10, %s1161_s11  ;;  %v914_v10 = vsel %vm913_vm13, %v1257_v48, %v418_v27  ;;  %v88_v48 = vmul.f32 0.5, %v80_v8 }
 0x770   :  { %v789_v15 = vrot.slane %v88_v48, %v1244_v19 }
 0x772   :  { %v790_v4 = vsel %vm182_vm3, %v789_v15, %v785_v14  ;;  %vm917_vm3 = vcmask 23552  }
 0x7ea   :  { %v614_v61 = vpop.xlane.xlu1 %613 }
 0x7eb   :  { %v615_v63 = vcvt.f32.s32 %v614_v61 }
 0x7ed   :  { %v618_v2 = vadd.s32 %v617_v62, %v615_v63 }
 0x7ee   :  { %v701_v6 = vpop.permute.xlu1 %700 }
 0x7ef   :  { %vm619_vm15 = vcmp.eq.s32.totalorder %v1238_v13, %v618_v2  ;;  %v916_v3 = vsel %vm915_vm14, %v914_v10, %v618_v2 }
 0x7f0   :  { %v954_v5 = vsel %vm619_vm15, 1.0, %v1158_v1 }
 0x7f1   :  { %1025 = vmatmul.mubr.msk.f32.vlgmr.msra.gmra.mrb[4].mxu1 %vm198_vm4, %v954_v5 }
 0x7f2   :  { %1065 = vmatpush3.bf16.xpose.msk.msra.mxu1 %vm1222_vm2, %v1063_v54  ;;  %1031 = vmatprep.mubr.msk.f32.mxu1 %vm1157_vm0, %v1158_v1 }
 0x7f9   :  { %1032 = vmatmul.mubr.msk.f32.vlgmr.msra.gmra.mrb[6].mxu1 %vm56_vm1, %v701_v6 }
 0x8c4   :  { %v691_v11 = vpop.f32.mrb[4].mxu1 }
 0x8c5   :  { %v1026_v12 = vpop.f32.mrb[5].mxu1 }
 0x8cc   :  { %v776_v16 = vpop.f32.mrb[6].mxu1 }
 0x8cd   :  { %v798_v18 = vsub.f32 %v776_v16, %v790_v4  ;;  %v1033_v20 = vpop.f32.mrb[7].mxu1 }
 0x8cf   :  { %v799_v21 = vsel %vm198_vm4, %v798_v18, -inf }
 0x8d0   :  { %800 = vmax.xlane.f32.xlu0 %v799_v21 }
 0x95d   :  { %v801_v22 = vpop.xlane.xlu0 %800 }
 0x95e   :  { %vm802_vm0 = vcmp.eq.f32.partialorder %v798_v18, %v801_v22 }
 0x95f   :  { %v803_v23 = vsel %vm802_vm0, %v1238_v13, 16 }
 0x960   :  { %v804_v24 = vsel %vm198_vm4, %v803_v23, 2147483647 }
 0x961   :  { %v806_v25 = vshra.s32 %v804_v24, 16  ;;  %v805_v17 = vand.u32 65535, %v804_v24 }
 0x963   :  { %v808_v26 = vcvt.s32.f32 %v806_v25  ;;  %v807_v27 = vcvt.s32.f32 %v805_v17 }
 0x965   :  { %809 = vmin.xlane.f32.xlu0 %v808_v26 }
 0x97b   :  { %896 = vrot.lane.b32.xlu0 %v1295_v34, %s1161_s11 }
 0x97f   :  { %900 = vrot.lane.b32.xlu0 %v691_v11, %s1160_s10 }
 0x9f2   :  { %v810_v19 = vpop.xlane.xlu0 %809 }
 0x9f3   :  { %vm811_vm2 = vcmp.eq.f32.partialorder %v808_v26, %v810_v19  ;;  %v816_v29 = vcvt.f32.s32 %v810_v19 }
 0x9f4   :  { %v812_v28 = vsel %vm811_vm2, %v807_v27, inf }
 0x9f5   :  { %813 = vmin.xlane.f32.xlu1 %v812_v28  ;;  %v817_v31 = vshll.u32 %v816_v29, 16 }
 0x9f6   :  { %v897_v38 = vpop.permute.xlu0 %896 }
 0x9fa   :  { %v901_v0 = vpop.permute.xlu0 %900 }
 0xa82   :  { %v814_v30 = vpop.xlane.xlu1 %813 }
 0xa83   :  { %v815_v32 = vcvt.f32.s32 %v814_v30 }
 0xa85   :  { %v818_v33 = vadd.s32 %v817_v31, %v815_v32 }
 0xa87   :  { %vm819_vm6 = vcmp.eq.s32.totalorder %v1238_v13, %v818_v33  ;;  %v918_v35 = vsel %vm917_vm3, %v916_v3, %v818_v33  ;;  %v907_v13 = vsel %vm56_vm1, %v1271_v55, %v897_v38 }
 0xa88   :  { %v959_v34 = vsel %vm819_vm6, 1.0, %v1158_v1  ;;  %920 = vst.msk [vmem:[%s1349_s3] sm:$0xff] %vm919_vm5, %v918_v35  ;;  %v909_v1 = vsel %vm908_vm7, %v907_v13, %v901_v0  ;;  %s1124_s3 = scalar_lea.vmem %s928_s15, 128 }
 0xa89   :  { %1039 = vmatmul.mubr.msk.f32.vlgmr.msra.gmra.mrb[6].mxu0 %vm198_vm4, %v959_v34  ;;  %p1125_p2 = scmp.ne.s32.totalorder %s928_s15, %s1124_s3  ;;  %p1130_p4 = scmp.lt.s32.totalorder %s1124_s3, %s1124_s3 }
 0xa8b   :  { %p1131_p5 = por %p1130_p4, %p1129_p3 }
 0xa8d   :  { %p1132_p6 = pnand %p1131_p5, %p1125_p2 }
 0xb5c   :  { %v891_v36 = vpop.f32.mrb[6].mxu0 }
 0xb5d   :  { %904 = vrot.lane.b32.xlu0 %v891_v36, %s1159_s1  ;;  %v1040_v37 = vpop.f32.mrb[7].mxu0 }
 0xbcf   :  { %v905_v39 = vpop.permute.xlu0 %904 }
 0xbd0   :  { %v911_v40 = vsel %vm910_vm8, %v909_v1, %v905_v39 }
 0xbd1   :  { %912 = vst [vmem:[#allocation7] sm:$0xff] %v911_v40 }
 0xbd2   :  { %1135 = shalt.err (!%p1132_p6)
}
 0xbd3   :  { %s1136_s18 = scalar_lea.hbm %s1348_s2, 128 }
 0xbd4   :  { %p1137_p7 = scmp.ne.s32.totalorder %s1348_s2, %s1136_s18  ;;  %p1140_p8 = scmp.lt.u32.totalorder %s1136_s18, %s1348_s2 }
 0xbd6   :  { %p1142_p9 = pnand %p1140_p8, %p1137_p7 }
 0xbd8   :  { %1145 = shalt.err (!%p1142_p9)
}
 0xbd9   :  { %930 = dma.vmem_to_hbm [thread:$0]  %s928_s15, 128, %s1348_s2, [#allocation4]  }
 0xbda   :  { %1150 = dma.done.wait [#allocation4], 128  }
 0xbdb   :  { %1151 = vsyncadd [#allocation4], 4294967168 }
 0xbdc   :  { %938 = vsyncpa [#allocation3], 1 }
 0xbdd   :  { %939 = vsyncpa [#allocation6], 1 }
 0xbde   :  { %940 = vsyncpa [#allocation4], 1 }

</bundles_post_ra>
